<compile_context>
chip_gen: v5e
topology: v5e:2x2
jax: 0.10.0
libtpu: 0.0.40
codegen_flags: <defaults>
</compile_context>

<pallas_src>
import functools

import jax
import jax.numpy as jnp
from jax.experimental import pallas as pl
from jax.experimental.pallas import tpu as pltpu


# ----------------------------------------------------------------------------
# Kernel
# ----------------------------------------------------------------------------
def _make_mlp_kernel(n_layers):
    """Fused feature-major MLP: o = Wn @ relu(... relu(W1 @ x)), biases folded."""

    def kernel(*refs):
        x_ref = refs[0]
        w_refs = refs[1:1 + n_layers]
        o_ref = refs[1 + n_layers]
        mxu_dtype = w_refs[0].dtype

        h = x_ref[...]                                    # (in_dim+1, tile_b)
        for li, w_ref in enumerate(w_refs):
            # MXU matmul with f32 accumulation; inputs stay at param dtype.
            h = jnp.dot(w_ref[...], h, preferred_element_type=jnp.float32)
            if li < n_layers - 1:
                # ReLU in f32 on the VPU, then narrow back for the next MXU
                # pass.  The folded "ones" row passes through ReLU unchanged.
                h = jnp.maximum(h, 0.0).astype(mxu_dtype)
        o_ref[...] = h.astype(o_ref.dtype)                # lane-dense store

    return kernel


# ----------------------------------------------------------------------------
# Wrapper
# ----------------------------------------------------------------------------
def _round_up(x, m):
    return ((x + m - 1) // m) * m


def _pick_tile(batch, max_tile_b):
    """Lane-dense batch tile: multiple of 128, capped at max_tile_b."""
    tile = min(max(int(max_tile_b), 128),
               _round_up(max((batch + 1) // 2, 1), 128))
    return max(tile, 128)


@functools.partial(jax.jit, static_argnames=("max_tile_b",))
def mlp_predictor_forward(obs, packed_weights, *, max_tile_b=512):
    """Forward pass of MlpPredictor.

    obs:             (batch, input_dim)
    packed_weights:  tuple from pack_mlp_params() — augmented, feature-major
                     weights (bias folded as last column; ones-propagating row
                     on every layer except the last).
    Returns (batch, output_dim) in the parameter dtype.
    """
    weights = tuple(packed_weights)
    n_layers = len(weights)
    batch, input_dim = obs.shape
    in_aug = int(weights[0].shape[1])          # input_dim + 1
    out_dim = int(weights[-1].shape[0])
    dtype = weights[0].dtype
    assert input_dim == in_aug - 1, "obs feature dim does not match weights"

    tile = _pick_tile(batch, max_tile_b)
    grid_n = max(2, pl.cdiv(batch, tile))      # >= 2 steps -> both v7x TCs busy
    padded = grid_n * tile

    # Feature-major input with the bias-folding "ones" row, zero-padded on the
    # batch axis to a whole number of lane-dense tiles (layout plumbing only).
    x_t = jnp.concatenate(
        [obs.T.astype(dtype), jnp.ones((1, batch), dtype)], axis=0)
    x_t = jnp.pad(x_t, ((0, 0), (0, padded - batch)))

    itemsize = jnp.dtype(dtype).itemsize
    flops = 2 * padded * sum(int(w.shape[0] * w.shape[1]) for w in weights)
    bytes_accessed = itemsize * (
        in_aug * padded + out_dim * padded + sum(int(w.size) for w in weights))

    weight_specs = [
        pl.BlockSpec(tuple(int(d) for d in w.shape), lambda i: (0, 0))
        for w in weights
    ]

    out_t = pl.pallas_call(
        _make_mlp_kernel(n_layers),
        out_shape=jax.ShapeDtypeStruct((out_dim, padded), dtype),
        grid_spec=pl.GridSpec(
            grid=(grid_n,),
            in_specs=[pl.BlockSpec((in_aug, tile), lambda i: (0, i))]
                     + weight_specs,
            out_specs=pl.BlockSpec((out_dim, tile), lambda i: (0, i)),
        ),
        compiler_params=pltpu.CompilerParams(
            dimension_semantics=("parallel",),
        ),
        cost_estimate=pl.CostEstimate(
            flops=flops, transcendentals=0, bytes_accessed=bytes_accessed),
    )(x_t, *weights)

    # Back to the module's (batch, output_dim) layout; drop padded columns.
    return out_t[:, :batch].T


# ----------------------------------------------------------------------------
# Parameter init (matches the PyTorch module) + packing for the kernel
# ----------------------------------------------------------------------------
def _orthogonal(key, out_dim, in_dim):
    """Deterministic orthogonal init matching nn.init.orthogonal_ semantics."""
    n = max(out_dim, in_dim)
    a = jax.random.normal(key, (n, n), dtype=jnp.float32)
    q, r = jnp.linalg.qr(a)
    q = q * jnp.sign(jnp.diagonal(r))          # make the decomposition unique
    return q[:out_dim, :in_dim]


def init_mlp_predictor_params(key, input_dim, hidden_dim, output_dim,
                              hidden_depth):
    """PyTorch-layout params: list of (W(out,in), b(out,)) per Linear layer.
    Weights orthogonal, biases zero (weight_init)."""
    if hidden_depth == 0:
        dims = [(output_dim, input_dim)]
    else:
        dims = ([(hidden_dim, input_dim)]
                + [(hidden_dim, hidden_dim)] * (hidden_depth - 1)
                + [(output_dim, hidden_dim)])
    keys = jax.random.split(key, len(dims))
    return [(_orthogonal(k, o, i), jnp.zeros((o,), jnp.float32))
            for k, (o, i) in zip(keys, dims)]


def pack_mlp_params(raw_params, dtype=jnp.float32):
    """Fold each bias into its weight: W_aug = [W | b].  On every layer except
    the last, also append a [0,...,0,1] row so a constant 'ones' row propagates
    through ReLU (relu(1)=1) and carries the next layer's bias."""
    packed = []
    n = len(raw_params)
    for li, (w, b) in enumerate(raw_params):
        wa = jnp.concatenate([w, b[:, None]], axis=1)
        if li < n - 1:
            ones_row = jnp.zeros((1, wa.shape[1]), wa.dtype).at[0, -1].set(1.0)
            wa = jnp.concatenate([wa, ones_row], axis=0)
        packed.append(wa.astype(dtype))
    return tuple(packed)


def _reference_forward(obs, raw_params):
    """Pure-JAX f32 reference matching the PyTorch module (y = x @ W.T + b)."""
    h = obs.astype(jnp.float32)
    for li, (w, b) in enumerate(raw_params):
        h = h @ w.T.astype(jnp.float32) + b.astype(jnp.float32)
        if li < len(raw_params) - 1:
            h = jnp.maximum(h, 0.0)
    return h


# ----------------------------------------------------------------------------
# Demo / self-test
# ----------------------------------------------------------------------------
if __name__ == "__main__":
    # MlpPredictor(input_dim=16, output_dim=8, hidden_dim=32, hidden_depth=2)
    input_dim, hidden_dim, output_dim, hidden_depth = 16, 32, 8, 2

    key = jax.random.PRNGKey(0)
    k_obs1, k_obs2, k_params = jax.random.split(key, 3)

    raw_params = init_mlp_predictor_params(
        k_params, input_dim, hidden_dim, output_dim, hidden_depth)

    # --- small f32 check (tight tolerance) ---
    batch = 8
    obs = jax.random.normal(k_obs1, (batch, input_dim), dtype=jnp.float32)
    params_f32 = pack_mlp_params(raw_params, jnp.float32)
    out = jax.block_until_ready(mlp_predictor_forward(obs, params_f32))
    ref = _reference_forward(obs, raw_params)
    assert out.shape == (batch, output_dim)
    assert jnp.allclose(out, ref, atol=1e-5, rtol=1e-5), "f32 kernel mismatch"

    # --- larger bf16 run: multi-tile grid, bf16 HBM tensors (v6e/v7x path) ---
    batch2 = 1024
    obs2 = jax.random.normal(k_obs2, (batch2, input_dim), dtype=jnp.float32)
    params_bf16 = pack_mlp_params(raw_params, jnp.bfloat16)
    out2 = jax.block_until_ready(
        mlp_predictor_forward(obs2.astype(jnp.bfloat16), params_bf16))
    ref2 = _reference_forward(obs2, raw_params)
    assert out2.shape == (batch2, output_dim)
    assert bool(jnp.all(jnp.isfinite(out2.astype(jnp.float32))))
    assert jnp.allclose(out2.astype(jnp.float32), ref2, atol=0.3, rtol=0.05), \
        "bf16 kernel drifted too far from the f32 reference"

    print("KERNEL_OK")
</pallas_src>

<mosaic_0001>
module attributes {stable_mosaic.version = 11 : i64} {
  func.func @kernel(%arg0: i32, %arg1: memref<17x128xf32, #tpu.memory_space<vmem>>, %arg2: memref<33x17xf32, #tpu.memory_space<vmem>>, %arg3: memref<33x33xf32, #tpu.memory_space<vmem>>, %arg4: memref<8x33xf32, #tpu.memory_space<vmem>>, %arg5: memref<8x128xf32, #tpu.memory_space<vmem>>) attributes {dimension_semantics = [#tpu.dimension_semantics<parallel>], iteration_bounds = array<i64: 2>, scalar_prefetch = 0 : i64, scratch_operands = 0 : i64, tpu.core_type = #tpu.core_type<tc>, window_params = [{transform_indices = @transform_0, window_bounds = array<i64: 17, 128>}, {pipeline_mode = #tpu.pipeline_mode<synchronous>, transform_indices = @transform_1, window_bounds = array<i64: 33, 17>}, {pipeline_mode = #tpu.pipeline_mode<synchronous>, transform_indices = @transform_2, window_bounds = array<i64: 33, 33>}, {pipeline_mode = #tpu.pipeline_mode<synchronous>, transform_indices = @transform_3, window_bounds = array<i64: 8, 33>}, {transform_indices = @transform_4, window_bounds = array<i64: 8, 128>}]} {
    %c0 = arith.constant 0 : index
    %c0_0 = arith.constant 0 : index
    %0 = vector.load %arg1[%c0, %c0_0] : memref<17x128xf32, #tpu.memory_space<vmem>>, vector<17x128xf32>
    %c0_1 = arith.constant 0 : index
    %c0_2 = arith.constant 0 : index
    %1 = vector.load %arg2[%c0_1, %c0_2] : memref<33x17xf32, #tpu.memory_space<vmem>>, vector<33x17xf32>
    %cst = arith.constant dense<0.000000e+00> : vector<33x128xf32>
    %2 = tpu.matmul %1, %0, %cst {dimension_numbers = #tpu.dot_dimension_numbers<[1], [0], [0], [1], [0, 0, 1, 1], [], []>} : vector<33x17xf32>, vector<17x128xf32>, vector<33x128xf32> -> vector<33x128xf32>
    %cst_3 = arith.constant 0.000000e+00 : f32
    %3 = vector.broadcast %cst_3 : f32 to vector<33x128xf32>
    %4 = arith.maximumf %2, %3 : vector<33x128xf32>
    %c0_4 = arith.constant 0 : index
    %c0_5 = arith.constant 0 : index
    %5 = vector.load %arg3[%c0_4, %c0_5] : memref<33x33xf32, #tpu.memory_space<vmem>>, vector<33x33xf32>
    %cst_6 = arith.constant dense<0.000000e+00> : vector<33x128xf32>
    %6 = tpu.matmul %5, %4, %cst_6 {dimension_numbers = #tpu.dot_dimension_numbers<[1], [0], [0], [1], [0, 0, 1, 1], [], []>} : vector<33x33xf32>, vector<33x128xf32>, vector<33x128xf32> -> vector<33x128xf32>
    %cst_7 = arith.constant 0.000000e+00 : f32
    %7 = vector.broadcast %cst_7 : f32 to vector<33x128xf32>
    %8 = arith.maximumf %6, %7 : vector<33x128xf32>
    %c0_8 = arith.constant 0 : index
    %c0_9 = arith.constant 0 : index
    %9 = vector.load %arg4[%c0_8, %c0_9] : memref<8x33xf32, #tpu.memory_space<vmem>>, vector<8x33xf32>
    %cst_10 = arith.constant dense<0.000000e+00> : vector<8x128xf32>
    %10 = tpu.matmul %9, %8, %cst_10 {dimension_numbers = #tpu.dot_dimension_numbers<[1], [0], [0], [1], [0, 0, 1, 1], [], []>} : vector<8x33xf32>, vector<33x128xf32>, vector<8x128xf32> -> vector<8x128xf32>
    %c0_11 = arith.constant 0 : index
    %c0_12 = arith.constant 0 : index
    %11 = vector.load %arg5[%c0_11, %c0_12] : memref<8x128xf32, #tpu.memory_space<vmem>>, vector<8x128xf32>
    tpu.vector_store %arg5[%c0_11, %c0_12], %10 {strides = array<i32>} : memref<8x128xf32, #tpu.memory_space<vmem>>, vector<8x128xf32>,
    return
  }
  func.func @transform_0(%arg0: i32) -> (i32, i32) {
    %c0_i32 = arith.constant 0 : i32
    %c0_i32_0 = arith.constant 0 : i32
    return %c0_i32, %arg0 : i32, i32
  }
  func.func @transform_1(%arg0: i32) -> (i32, i32) {
    %c0_i32 = arith.constant 0 : i32
    %c0_i32_0 = arith.constant 0 : i32
    %c0_i32_1 = arith.constant 0 : i32
    return %c0_i32, %c0_i32_0 : i32, i32
  }
  func.func @transform_2(%arg0: i32) -> (i32, i32) {
    %c0_i32 = arith.constant 0 : i32
    %c0_i32_0 = arith.constant 0 : i32
    %c0_i32_1 = arith.constant 0 : i32
    return %c0_i32, %c0_i32_0 : i32, i32
  }
  func.func @transform_3(%arg0: i32) -> (i32, i32) {
    %c0_i32 = arith.constant 0 : i32
    %c0_i32_0 = arith.constant 0 : i32
    %c0_i32_1 = arith.constant 0 : i32
    return %c0_i32, %c0_i32_0 : i32, i32
  }
  func.func @transform_4(%arg0: i32) -> (i32, i32) {
    %c0_i32 = arith.constant 0 : i32
    %c0_i32_0 = arith.constant 0 : i32
    return %c0_i32, %arg0 : i32, i32
  }
}

</mosaic_0001>

<bundles_post_ra>
// kernel: mlp_predictor_forward.1
= control target key start
LH: loop header
LB: loop body
LE: loop exit
PB: predicated region body
PF: predicated region fallthrough
CT: control target
= control target key end

     0   :  { %s558_s15 = smov 0   ;;  %s560_s16 = smov 0   ;;  %s656_s0 = inlined_call_operand.vmem [shape: f32[17,256], index: 0, kind: input, shape index: {}]   ;;  %s657_s1 = inlined_call_operand.vmem [shape: f32[33,17], index: 1, kind: input, shape index: {}]   ;;  %s658_s2 = inlined_call_operand.vmem [shape: f32[33,33], index: 2, kind: input, shape index: {}]   ;;  %s659_s3 = inlined_call_operand.vmem [shape: f32[8,33], index: 3, kind: input, shape index: {}]   ;;  %s660_s4 = inlined_call_operand.vmem [shape: f32[8,256], index: 4, kind: output, shape index: {}]  }
   0x1   :  { %s562_s17 = smov 0  }
   0x2 LB: > { %s452_s18 = sadd.s32 4294967295, %s531_s17   ;;  %s575_s19 = sadd.s32 1, %s531_s17   ;;  %s531_s17 = sphi %s562_s17, %s663_s17   ;;  %s527_s16 = sphi %s560_s16, %s662_s16   ;;  %s523_s15 = sphi %s558_s15, %s661_s15  }
   0x3   : > { %s18_s20 = ssub.s32 %s531_s17, %s575_s19  ;;  %s21_s21 = sadd.s32 1, %s527_s16 }
   0x4   : > { %p19_p0 = scmp.eq.s32.totalorder %s18_s20, 0  ;;  %p28_p1 = scmp.ne.s32.totalorder %s527_s16, %s523_s15 }
   0x5   : > { %p29_p2 = scmp.eq.s32.totalorder %s531_s17, 0  ;;  %p455_p4 = scmp.ge.s32.totalorder %s531_s17, 2 }
   0x6   : > { %s584_s22 = scalar_select %p19_p0, %s527_s16, %s21_s21  }
   0x7   : > { %p30_p3 = por %p29_p2, %p28_p1  ;;  %152 = sbr.rel (%p455_p4) target bundleno = 19 (0x13), region = 28 }
   0xc   : > { %155 = sbr.rel (!%p30_p3) target bundleno = 19 (0x13), region = 32  ;;  %s157_s23 = sand.u32 (%p30_p3), 1, %s527_s16  }
   0xd   : > { %s456_s24 = sshll.u32 (%p30_p3), %s531_s17, 3  ;;  %s483_s25 = smul.u32 (%p30_p3), 24, %s157_s23 }
   0xe   : > { %s161_s28 = scalar_lea.vmem (%p30_p3), %s656_s0, %s456_s24 }
   0xf   : > { %v194_v0 = vld [vmem:[%s161_s28] sm:$0xff] (%p30_p3)  ;;  %v196_v1 = vld [vmem:[%s161_s28 + $0x10] sm:$0xff] (%p30_p3)  ;;  %s159_s29 = scalar_lea.vmem (%p30_p3), [#allocation2], %s483_s25 }
  0x10   : > { %v198_v2 = vld [vmem:[%s161_s28 + $0x20] sm:$0xff] (%p30_p3)  ;;  %195 = vst [vmem:[%s159_s29] sm:$0xff] (%p30_p3), %v194_v0 }
  0x11   : > { %197 = vst [vmem:[%s159_s29 + $0x8] sm:$0xff] %v196_v1 }
  0x12   : > { %199 = vst [vmem:[%s159_s29 + $0x10] sm:$0xff] %v198_v2 }
  0x13 PF: > { %p457_p5 = scmp.ge.s32.totalorder %s531_s17, 1  ;;  %p204_p6 = scmp.lt.s32.totalorder %s531_s17, 3 }
  0x15   : > { %p205_p7 = pnand %p457_p5, %p204_p6 }
  0x16   : > { %s211_s30 = sand.u32 (!%p205_p7), 1, %s523_s15   ;;  %p235_p8 = scmp.lt.s32.totalorder (!%p205_p7), %s452_s18, 1 }
  0x17   : > { %208 = sbr.rel (%p205_p7) target bundleno = 469 (0x1d5), region = 70 }
  0x18   : > { %s484_s5 = smul.u32 (!%p205_p7), 24, %s211_s30 }
  0x1a   : > { %s213_s6 = scalar_lea.vmem (!%p205_p7), [#allocation2], %s484_s5 }
  0x1c   : > { %vm263_vm0 = vcmask 1040384   ;;  %v241_v3 = vld [vmem:[%s213_s6 + $0x10] sm:$0x1]  ;;  %v240_v4 = vld [vmem:[%s213_s6 + $0x8] sm:$0xff]  ;;  %v239_v5 = vld [vmem:[%s213_s6] sm:$0xff]  ;;  %vm247_vm1 = vcmask 138240  }
  0x1d   : > { %475 = vmatpush.msk.msra.mxu2 %vm263_vm0, %v241_v3  ;;  %459 = vmatpush.msk.msra.mxu0 %vm263_vm0, %v241_v3  ;;  %v245_v6 = vld [vmem:[%s657_s1 + $0x18] sm:$0xff]  ;;  %v242_v7 = vld [vmem:[%s657_s1] sm:$0xff]  ;;  %v243_v9 = vld [vmem:[%s657_s1 + $0x8] sm:$0xff]  ;;  %vm309_vm2 = vcmask 269312   ;;  %s665_s18 = smov (!%p235_p8, %s452_s18), 1 }
  0x1e   : > { %v246_v8 = vld [vmem:[%s657_s1 + $0x20] sm:$0x1]  ;;  %v244_v10 = vld [vmem:[%s657_s1 + $0x10] sm:$0xff]  ;;  %v307_v21 = vld [vmem:[%s658_s2 + $0x18] sm:$0xff]  ;;  %s458_s8 = sshll.u32 %s665_s18, 3 }
  0x1f   : > { %476 = vmatpush.msra.mxu2 %v240_v4  ;;  %281 = vmatpush.msra.mxu0 %v240_v4  ;;  %v304_v22 = vld [vmem:[%s658_s2] sm:$0xff]  ;;  %v305_v24 = vld [vmem:[%s658_s2 + $0x8] sm:$0xff]  ;;  %v306_v25 = vld [vmem:[%s658_s2 + $0x10] sm:$0xff]  ;;  %s238_s11 = scalar_lea.vmem %s660_s4, %s458_s8 }
  0x20   : > { %v308_v23 = vld [vmem:[%s658_s2 + $0x20] sm:$0x1] }
  0x21   : > { %477 = vmatpush.msra.mxu2 %v239_v5  ;;  %282 = vmatpush.msra.mxu0 %v239_v5  ;;  %v365_v36 = vld [vmem:[%s659_s3] sm:$0xff] }
  0x22   : > { %463 = vmatmul.msk.f32.vlgmr.msra.gmra.mxu2 %vm247_vm1, %v245_v6  ;;  %460 = vmatmul.msk.f32.vlgmr.msra.gmra.mxu0 %vm247_vm1, %v242_v7 }
  0x2a   : > { %464 = vmatmul.msk.f32.gmra.mxu2 %vm247_vm1, %v246_v8  ;;  %461 = vmatmul.msk.f32.gmra.mxu0 %vm247_vm1, %v243_v9 }
  0x32   : > { %462 = vmatmul.msk.f32.gmra.mxu0 %vm247_vm1, %v244_v10 }
  0x9f   : > { %v284_v11 = vpop.f32.mrf.mxu0 }
  0xa0   : > { %v299_v20 = vmax.f32 %v284_v11, 0.0 }
  0xa5   : > { %v293_v12 = vpop.f32.mrf.mxu2 }
  0xa6   : > { %v302_v17 = vmax.f32 %v293_v12, 0.0 }
  0xa7   : > { %v287_v13 = vpop.f32.mrf.mxu0 }
  0xa8   : > { %v300_v19 = vmax.f32 %v287_v13, 0.0 }
  0xad   : > { %v296_v14 = vpop.f32.mrf.mxu2 }
  0xae   : > { %v303_v15 = vmax.f32 %v296_v14, 0.0 }
  0xaf   : > { %v290_v16 = vpop.f32.mrf.mxu0 }
  0xb0   : > { %465 = vmatpush.msk.msra.mxu1 %vm263_vm0, %v303_v15  ;;  %478 = vmatpush.msk.msra.mxu3 %vm263_vm0, %v303_v15  ;;  %v301_v18 = vmax.f32 %v290_v16, 0.0 }
  0xb2   : > { %340 = vmatpush.msra.mxu1 %v302_v17  ;;  %479 = vmatpush.msra.mxu3 %v302_v17 }
  0xb4   : > { %341 = vmatpush.msra.mxu1 %v301_v18  ;;  %480 = vmatpush.msra.mxu3 %v301_v18 }
  0xb6   : > { %342 = vmatpush.msra.mxu1 %v300_v19  ;;  %481 = vmatpush.msra.mxu3 %v300_v19 }
  0xb8   : > { %343 = vmatpush.msra.mxu1 %v299_v20  ;;  %482 = vmatpush.msra.mxu3 %v299_v20 }
  0xb9   : > { %469 = vmatmul.msk.f32.vlgmr.msra.gmra.mxu3 %vm309_vm2, %v307_v21  ;;  %466 = vmatmul.msk.f32.vlgmr.msra.gmra.mxu1 %vm309_vm2, %v304_v22 }
  0xc1   : > { %470 = vmatmul.msk.f32.gmra.mxu3 %vm309_vm2, %v308_v23  ;;  %467 = vmatmul.msk.f32.gmra.mxu1 %vm309_vm2, %v305_v24 }
  0xc9   : > { %468 = vmatmul.msk.f32.gmra.mxu1 %vm309_vm2, %v306_v25 }
 0x136   : > { %v345_v26 = vpop.f32.mrf.mxu1 }
 0x137   : > { %v360_v35 = vmax.f32 %v345_v26, 0.0 }
 0x13c   : > { %v354_v27 = vpop.f32.mrf.mxu3 }
 0x13d   : > { %v363_v32 = vmax.f32 %v354_v27, 0.0 }
 0x13e   : > { %v348_v28 = vpop.f32.mrf.mxu1 }
 0x13f   : > { %v361_v34 = vmax.f32 %v348_v28, 0.0 }
 0x144   : > { %v357_v29 = vpop.f32.mrf.mxu3 }
 0x145   : > { %v364_v30 = vmax.f32 %v357_v29, 0.0 }
 0x146   : > { %v351_v31 = vpop.f32.mrf.mxu1 }
 0x147   : > { %471 = vmatpush.msk.msrb.mxu2 %vm263_vm0, %v364_v30  ;;  %v362_v33 = vmax.f32 %v351_v31, 0.0 }
 0x149   : > { %384 = vmatpush.msrb.mxu2 %v363_v32 }
 0x14b   : > { %385 = vmatpush.msrb.mxu2 %v362_v33 }
 0x14d   : > { %386 = vmatpush.msrb.mxu2 %v361_v34 }
 0x14f   : > { %387 = vmatpush.msrb.mxu2 %v360_v35 }
 0x150   : > { %472 = vmatmul.msk.f32.vlgmr.msrb.gmra.mxu2 %vm309_vm2, %v365_v36 }
 0x1d3   : > { %v389_v37 = vpop.f32.mrf.mxu2 }
 0x1d4   : > { %392 = vst [vmem:[%s238_s11] sm:$0xff] %v389_v37 }
 0x1d5 PF: > { %p11_p9 = scmp.ge.s32.totalorder %s575_s19, 4   ;;  %s661_s15 = smov %s527_s16 }
 0x1d6   : > { %s662_s16 = smov %s584_s22  ;;  %s663_s17 = smov %s575_s19 }
 0x1d7   :  { %13 = sbr.rel (!%p11_p9) target bundleno = 2 (0x2), region = 109 }

</bundles_post_ra>
